<compile_context>
chip_gen: v6e
topology: v6e:2x2x1
jax: 0.10.0
libtpu: 0.0.40
codegen_flags: <defaults>
</compile_context>

<pallas_src>
import functools

import jax
import jax.numpy as jnp
from jax import lax
from jax.experimental import pallas as pl
from jax.experimental.pallas import tpu as pltpu

LANES = 128
CHUNK_ROWS = 512                 # rows folded into the accumulator per inner step
TARGET_BLOCK_BYTES = 2 << 20     # ~2 MiB per stream per pipeline buffer


def _sublane_pack(*dtypes):
    """Sublane packing factor so sub-32-bit tiles DMA without relayout."""
    pack = 8
    for dt in dtypes:
        pack = max(pack, 32 // max(1, jnp.dtype(dt).itemsize))
    return pack


def _num_tensorcores():
    """Best-effort TensorCore count (2 on multi-TC chips, else 1)."""
    try:
        info = pltpu.get_tpu_info()
    except Exception:
        return 1
    for name in ("num_cores", "core_count", "num_tensorcores",
                 "tensorcore_count", "cores_per_chip", "num_cores_per_chip"):
        v = getattr(info, name, None)
        if isinstance(v, int) and 1 <= v <= 8:
            return v
    return 1


def _bce_elementwise(x, y):
    # Numerically stable BCE-with-logits (same formulation PyTorch uses):
    #   loss = max(x, 0) - x*y + log1p(exp(-|x|))
    x = x.astype(jnp.float32)
    y = y.astype(jnp.float32)
    return jnp.maximum(x, 0.0) - x * y + jnp.log1p(jnp.exp(-jnp.abs(x)))


def _bce_sum_kernel(x_ref, y_ref, o_ref, acc_ref, *,
                    rows_valid, block_rows, chunk_rows, steps_per_core):
    """Accumulates the sum of elementwise BCE-with-logits.

    x_ref, y_ref : (block_rows, LANES) logits / targets tiles (any float dtype).
    o_ref        : (1, 1) f32 SMEM per-core partial sum.
    acc_ref      : (8, LANES) f32 VMEM vector accumulator (per core).
    """
    c = pl.program_id(0)          # "parallel" core axis
    i = pl.program_id(1)          # "arbitrary" reduction axis

    @pl.when(i == 0)
    def _init():
        acc_ref[...] = jnp.zeros_like(acc_ref)

    blk = c * steps_per_core + i          # un-clamped logical block index
    row_start = blk * block_rows
    n_chunks = block_rows // chunk_rows

    def chunk_loss(ci):
        r0 = ci * chunk_rows
        x = x_ref[pl.ds(r0, chunk_rows), :].astype(jnp.float32)
        y = y_ref[pl.ds(r0, chunk_rows), :].astype(jnp.float32)
        return jnp.maximum(x, 0.0) - x * y + jnp.log1p(jnp.exp(-jnp.abs(x)))

    def fold(v):
        # (chunk_rows,128) -> (8,128) partial sums: layout-free reshape + VPU adds.
        return v.reshape(chunk_rows // 8, 8, LANES).sum(axis=0)

    is_full = row_start + block_rows <= rows_valid

    @pl.when(is_full)
    def _interior():
        def body(ci, carry):
            return carry + fold(chunk_loss(ci))
        acc_ref[...] += lax.fori_loop(
            0, n_chunks, body, jnp.zeros((8, LANES), jnp.float32), unroll=True)

    @pl.when(jnp.logical_not(is_full))
    def _tail():
        # Block straddles (or lies past) the valid rows: mask by global row.
        # jnp.where (not multiply) so NaN/Inf garbage beyond the array cannot
        # poison the sum.
        def body(ci, carry):
            loss = chunk_loss(ci)
            r = lax.broadcasted_iota(jnp.int32, (chunk_rows, LANES), 0)
            grow = row_start + ci * chunk_rows + r
            return carry + fold(jnp.where(grow < rows_valid, loss, 0.0))
        acc_ref[...] += lax.fori_loop(
            0, n_chunks, body, jnp.zeros((8, LANES), jnp.float32), unroll=True)

    @pl.when(i == pl.num_programs(1) - 1)
    def _finalize():
        o_ref[0, 0] = jnp.sum(acc_ref[...])


@jax.jit
def ce_loss(logits, targets):
    """Pallas equivalent of F.binary_cross_entropy_with_logits(input, target)
    with the default 'mean' reduction.  Accepts any matching shapes/dtypes."""
    assert logits.shape == targets.shape, (logits.shape, targets.shape)
    n = logits.size
    if n == 0:
        return jnp.float32(0.0)   # guard divide-by-zero edge case

    x = logits.reshape(-1)
    y = targets.reshape(-1)

    pack = _sublane_pack(x.dtype, y.dtype)
    rem = n % LANES
    n_main = n - rem
    rows_full = n_main // LANES

    total = jnp.float32(0.0)
    use_kernel = rows_full >= pack

    if use_kernel:
        if rem:
            # TODO(synk): non-128-aligned element counts force one prefix copy
            # for the reshape; 128-aligned counts (the common case) are zero-copy.
            x_main, y_main = x[:n_main], y[:n_main]
        else:
            x_main, y_main = x, y
        x2 = x_main.reshape(rows_full, LANES)
        y2 = y_main.reshape(rows_full, LANES)

        # Dtype-aware block sizing: ~2 MiB per stream per buffer.
        max_itemsize = max(x.dtype.itemsize, y.dtype.itemsize)
        max_block_rows = max(
            CHUNK_ROWS,
            (TARGET_BLOCK_BYTES // (LANES * max_itemsize)) // CHUNK_ROWS * CHUNK_ROWS)

        if rows_full >= CHUNK_ROWS:
            chunk_rows = CHUNK_ROWS
            block_rows = min(max_block_rows, (rows_full // CHUNK_ROWS) * CHUNK_ROWS)
        else:
            block_rows = (rows_full // pack) * pack   # multiple of pack (>= 8)
            chunk_rows = block_rows

        num_blocks = -(-rows_full // block_rows)
        num_cores = max(1, min(_num_tensorcores(), num_blocks))
        steps_per_core = -(-num_blocks // num_cores)

        def in_index_map(c, i):
            # Overshoot steps (uneven core split) clamp onto the last block;
            # the kernel's row mask zeroes their contribution.
            return (jnp.minimum(c * steps_per_core + i, num_blocks - 1), 0)

        tile_spec = pl.BlockSpec((block_rows, LANES), in_index_map)

        kernel = functools.partial(
            _bce_sum_kernel,
            rows_valid=rows_full,
            block_rows=block_rows,
            chunk_rows=chunk_rows,
            steps_per_core=steps_per_core,
        )

        # 2 streams x 2 pipeline buffers + accumulator + headroom.
        vmem_limit = int(
            2 * block_rows * LANES * (x.dtype.itemsize + y.dtype.itemsize)
            + (4 << 20))

        partials = pl.pallas_call(
            kernel,
            out_shape=jax.ShapeDtypeStruct((num_cores, 1), jnp.float32),
            grid_spec=pltpu.PrefetchScalarGridSpec(
                num_scalar_prefetch=0,
                grid=(num_cores, steps_per_core),
                in_specs=[tile_spec, tile_spec],
                out_specs=pl.BlockSpec((1, 1), lambda c, i: (c, 0),
                                       memory_space=pltpu.SMEM),
                scratch_shapes=[pltpu.VMEM((8, LANES), jnp.float32)],
            ),
            compiler_params=pltpu.CompilerParams(
                dimension_semantics=("parallel", "arbitrary"),
                vmem_limit_bytes=vmem_limit,
            ),
        )(x2, y2)
        total = total + jnp.sum(partials)

        xla_x, xla_y = x[n_main:], y[n_main:]     # <128 leftover elements
    else:
        xla_x, xla_y = x, y                        # tiny input: pure XLA

    if xla_x.size:
        total = total + jnp.sum(_bce_elementwise(xla_x, xla_y))

    return (total / jnp.float32(n)).astype(jnp.float32)


def _reference(logits, targets):
    return jnp.mean(_bce_elementwise(logits, targets))


if __name__ == "__main__":
    key = jax.random.PRNGKey(0)
    k1, k2, k3, k4 = jax.random.split(key, 4)

    # NCHW-shaped inputs, consistent with a segmentation-style logits/target pair.
    x = jax.random.normal(k1, (2, 4, 16, 16), dtype=jnp.float32)
    t = (jax.random.uniform(k2, (2, 4, 16, 16)) > 0.5).astype(jnp.float32)
    out = ce_loss(x, t)
    jax.block_until_ready(out)
    ref = _reference(x, t)
    assert jnp.allclose(out, ref, atol=1e-5, rtol=1e-5), (out, ref)

    # Non-128-aligned element count exercises the ragged-block mask + XLA
    # remainder paths.
    x2 = jax.random.normal(k3, (3, 5, 7, 11), dtype=jnp.float32)
    t2 = (jax.random.uniform(k4, (3, 5, 7, 11)) > 0.5).astype(jnp.float32)
    out2 = ce_loss(x2, t2)
    jax.block_until_ready(out2)
    ref2 = _reference(x2, t2)
    assert jnp.allclose(out2, ref2, atol=1e-5, rtol=1e-5), (out2, ref2)

    print("KERNEL_OK")
</pallas_src>

<mosaic_0001>
module attributes {stable_mosaic.version = 11 : i64} {
  func.func @_bce_sum_kernel(%arg0: i32, %arg1: i32, %arg2: memref<16x128xf32, #tpu.memory_space<vmem>>, %arg3: memref<16x128xf32, #tpu.memory_space<vmem>>, %arg4: memref<1x1xf32, #tpu.memory_space<smem>>, %arg5: memref<8x128xf32, #tpu.memory_space<vmem>>) attributes {dimension_semantics = [#tpu.dimension_semantics<parallel>, #tpu.dimension_semantics<arbitrary>], iteration_bounds = array<i64: 1, 1>, scalar_prefetch = 0 : i64, scratch_operands = 1 : i64, tpu.core_type = #tpu.core_type<tc>, window_params = [{transform_indices = @transform_0, window_bounds = array<i64: 16, 128>}, {transform_indices = @transform_1, window_bounds = array<i64: 16, 128>}, {transform_indices = @transform_2, window_bounds = array<i64: 1, 1>}]} {
    %c0_i32 = arith.constant 0 : i32
    %0 = arith.cmpi eq, %arg1, %c0_i32 : i32
    %1 = arith.extui %0 : i1 to i32
    %c0_i32_0 = arith.constant 0 : i32
    %2 = arith.cmpi ne, %1, %c0_i32_0 : i32
    scf.if %2 {
      %cst = arith.constant 0.000000e+00 : f32
      %16 = vector.broadcast %cst : f32 to vector<8x128xf32>
      %c0 = arith.constant 0 : index
      %c0_7 = arith.constant 0 : index
      %17 = vector.load %arg5[%c0, %c0_7] : memref<8x128xf32, #tpu.memory_space<vmem>>, vector<8x128xf32>
      tpu.vector_store %arg5[%c0, %c0_7], %16 {strides = array<i32>} : memref<8x128xf32, #tpu.memory_space<vmem>>, vector<8x128xf32>,
    } else {
    }
    %c1_i32 = arith.constant 1 : i32
    %3 = arith.muli %arg0, %c1_i32 : i32
    %4 = arith.addi %3, %arg1 : i32
    %c16_i32 = arith.constant 16 : i32
    %5 = arith.muli %4, %c16_i32 : i32
    %c16_i32_1 = arith.constant 16 : i32
    %6 = arith.addi %5, %c16_i32_1 : i32
    %c16_i32_2 = arith.constant 16 : i32
    %7 = arith.cmpi sle, %6, %c16_i32_2 : i32
    %8 = arith.extui %7 : i1 to i32
    %c0_i32_3 = arith.constant 0 : i32
    %9 = arith.cmpi ne, %8, %c0_i32_3 : i32
    scf.if %9 {
      %c0 = arith.constant 0 : index
      %c0_7 = arith.constant 0 : index
      %16 = vector.load %arg5[%c0, %c0_7] : memref<8x128xf32, #tpu.memory_space<vmem>>, vector<8x128xf32>
      %cst = arith.constant 0.000000e+00 : f32
      %17 = vector.broadcast %cst : f32 to vector<8x128xf32>
      %c0_i32_8 = arith.constant 0 : i32
      %c16_i32_9 = arith.constant 16 : i32
      %18 = arith.muli %c0_i32_8, %c16_i32_9 : i32
      %19 = arith.index_cast %18 : i32 to index
      %c0_10 = arith.constant 0 : index
      %20 = vector.load %arg2[%19, %c0_10] : memref<16x128xf32, #tpu.memory_space<vmem>>, vector<16x128xf32>
      %21 = arith.index_cast %18 : i32 to index
      %c0_11 = arith.constant 0 : index
      %22 = vector.load %arg3[%21, %c0_11] : memref<16x128xf32, #tpu.memory_space<vmem>>, vector<16x128xf32>
      %cst_12 = arith.constant 0.000000e+00 : f32
      %23 = vector.broadcast %cst_12 : f32 to vector<16x128xf32>
      %24 = arith.maximumf %20, %23 : vector<16x128xf32>
      %25 = arith.mulf %20, %22 : vector<16x128xf32>
      %26 = arith.subf %24, %25 : vector<16x128xf32>
      %27 = math.absf %20 : vector<16x128xf32>
      %cst_13 = arith.constant 0.000000e+00 : f32
      %28 = vector.broadcast %cst_13 : f32 to vector<16x128xf32>
      %29 = arith.subf %28, %27 : vector<16x128xf32>
      %30 = math.exp %29 : vector<16x128xf32>
      %31 = math.log1p %30 : vector<16x128xf32>
      %32 = arith.addf %26, %31 : vector<16x128xf32>
      %33 = vector.shape_cast %32 : vector<16x128xf32> to vector<2x8x128xf32>
      %cst_14 = arith.constant dense<0.000000e+00> : vector<8x128xf32>
      %34 = vector.multi_reduction <add>, %33, %cst_14 [0] : vector<2x8x128xf32> to vector<8x128xf32>
      %35 = arith.addf %17, %34 : vector<8x128xf32>
      %c1_i32_15 = arith.constant 1 : i32
      %36 = arith.addf %16, %35 : vector<8x128xf32>
      %c0_16 = arith.constant 0 : index
      %c0_17 = arith.constant 0 : index
      %37 = vector.load %arg5[%c0_16, %c0_17] : memref<8x128xf32, #tpu.memory_space<vmem>>, vector<8x128xf32>
      tpu.vector_store %arg5[%c0_16, %c0_17], %36 {strides = array<i32>} : memref<8x128xf32, #tpu.memory_space<vmem>>, vector<8x128xf32>,
    } else {
    }
    %true = arith.constant true
    %10 = arith.xori %7, %true : i1
    %11 = arith.extui %10 : i1 to i32
    %c0_i32_4 = arith.constant 0 : i32
    %12 = arith.cmpi ne, %11, %c0_i32_4 : i32
    scf.if %12 {
      %c0 = arith.constant 0 : index
      %c0_7 = arith.constant 0 : index
      %16 = vector.load %arg5[%c0, %c0_7] : memref<8x128xf32, #tpu.memory_space<vmem>>, vector<8x128xf32>
      %cst = arith.constant 0.000000e+00 : f32
      %17 = vector.broadcast %cst : f32 to vector<8x128xf32>
      %c0_i32_8 = arith.constant 0 : i32
      %c16_i32_9 = arith.constant 16 : i32
      %18 = arith.muli %c0_i32_8, %c16_i32_9 : i32
      %19 = arith.index_cast %18 : i32 to index
      %c0_10 = arith.constant 0 : index
      %20 = vector.load %arg2[%19, %c0_10] : memref<16x128xf32, #tpu.memory_space<vmem>>, vector<16x128xf32>
      %21 = arith.index_cast %18 : i32 to index
      %c0_11 = arith.constant 0 : index
      %22 = vector.load %arg3[%21, %c0_11] : memref<16x128xf32, #tpu.memory_space<vmem>>, vector<16x128xf32>
      %cst_12 = arith.constant 0.000000e+00 : f32
      %23 = vector.broadcast %cst_12 : f32 to vector<16x128xf32>
      %24 = arith.maximumf %20, %23 : vector<16x128xf32>
      %25 = arith.mulf %20, %22 : vector<16x128xf32>
      %26 = arith.subf %24, %25 : vector<16x128xf32>
      %27 = math.absf %20 : vector<16x128xf32>
      %cst_13 = arith.constant 0.000000e+00 : f32
      %28 = vector.broadcast %cst_13 : f32 to vector<16x128xf32>
      %29 = arith.subf %28, %27 : vector<16x128xf32>
      %30 = math.exp %29 : vector<16x128xf32>
      %31 = math.log1p %30 : vector<16x128xf32>
      %32 = arith.addf %26, %31 : vector<16x128xf32>
      %33 = tpu.iota {dimensions = array<i32: 0>} : vector<16x128xi32>
      %c16_i32_14 = arith.constant 16 : i32
      %34 = arith.muli %c0_i32_8, %c16_i32_14 : i32
      %35 = arith.addi %5, %34 : i32
      %36 = vector.broadcast %35 : i32 to vector<16x128xi32>
      %37 = arith.addi %36, %33 : vector<16x128xi32>
      %c16_i32_15 = arith.constant 16 : i32
      %38 = vector.broadcast %c16_i32_15 : i32 to vector<16x128xi32>
      %39 = arith.cmpi slt, %37, %38 : vector<16x128xi32>
      %cst_16 = arith.constant 0.000000e+00 : f32
      %40 = vector.broadcast %cst_16 : f32 to vector<16x128xf32>
      %41 = arith.select %39, %32, %40 : vector<16x128xi1>, vector<16x128xf32>
      %42 = vector.shape_cast %41 : vector<16x128xf32> to vector<2x8x128xf32>
      %cst_17 = arith.constant dense<0.000000e+00> : vector<8x128xf32>
      %43 = vector.multi_reduction <add>, %42, %cst_17 [0] : vector<2x8x128xf32> to vector<8x128xf32>
      %44 = arith.addf %17, %43 : vector<8x128xf32>
      %c1_i32_18 = arith.constant 1 : i32
      %45 = arith.addf %16, %44 : vector<8x128xf32>
      %c0_19 = arith.constant 0 : index
      %c0_20 = arith.constant 0 : index
      %46 = vector.load %arg5[%c0_19, %c0_20] : memref<8x128xf32, #tpu.memory_space<vmem>>, vector<8x128xf32>
      tpu.vector_store %arg5[%c0_19, %c0_20], %45 {strides = array<i32>} : memref<8x128xf32, #tpu.memory_space<vmem>>, vector<8x128xf32>,
    } else {
    }
    %c0_i32_5 = arith.constant 0 : i32
    %13 = arith.cmpi eq, %arg1, %c0_i32_5 : i32
    %14 = arith.extui %13 : i1 to i32
    %c0_i32_6 = arith.constant 0 : i32
    %15 = arith.cmpi ne, %14, %c0_i32_6 : i32
    scf.if %15 {
      %c0 = arith.constant 0 : index
      %c0_7 = arith.constant 0 : index
      %16 = vector.load %arg5[%c0, %c0_7] : memref<8x128xf32, #tpu.memory_space<vmem>>, vector<8x128xf32>
      %17 = vector.shape_cast %16 : vector<8x128xf32> to vector<1x8x128xf32>
      %cst = arith.constant dense<0.000000e+00> : vector<1xf32>
      %18 = vector.multi_reduction <add>, %17, %cst [1, 2] : vector<1x8x128xf32> to vector<1xf32>
      %19 = vector.shape_cast %18 : vector<1xf32> to vector<1x1x1xf32>
      %20 = vector.extract %19[0, 0, 0] : f32 from vector<1x1x1xf32>
      %c0_8 = arith.constant 0 : index
      %c0_9 = arith.constant 0 : index
      %21 = memref.load %arg4[%c0_8, %c0_9] : memref<1x1xf32, #tpu.memory_space<smem>>
      memref.store %20, %arg4[%c0_8, %c0_9] : memref<1x1xf32, #tpu.memory_space<smem>>
    } else {
    }
    return
  }
  func.func @transform_0(%arg0: i32, %arg1: i32) -> (i32, i32) {
    %c1_i32 = arith.constant 1 : i32
    %0 = arith.muli %arg0, %c1_i32 : i32
    %1 = arith.addi %0, %arg1 : i32
    %c0_i32 = arith.constant 0 : i32
    %2 = arith.minsi %1, %c0_i32 : i32
    %c0_i32_0 = arith.constant 0 : i32
    %c0_i32_1 = arith.constant 0 : i32
    return %2, %c0_i32_0 : i32, i32
  }
  func.func @transform_1(%arg0: i32, %arg1: i32) -> (i32, i32) {
    %c1_i32 = arith.constant 1 : i32
    %0 = arith.muli %arg0, %c1_i32 : i32
    %1 = arith.addi %0, %arg1 : i32
    %c0_i32 = arith.constant 0 : i32
    %2 = arith.minsi %1, %c0_i32 : i32
    %c0_i32_0 = arith.constant 0 : i32
    %c0_i32_1 = arith.constant 0 : i32
    return %2, %c0_i32_0 : i32, i32
  }
  func.func @transform_2(%arg0: i32, %arg1: i32) -> (i32, i32) {
    %c0_i32 = arith.constant 0 : i32
    %c0_i32_0 = arith.constant 0 : i32
    return %arg0, %c0_i32 : i32, i32
  }
}

</mosaic_0001>

<bundles_post_ra>
// kernel: ce_loss.1
= control target key start
LH: loop header
LB: loop body
LE: loop exit
PB: predicated region body
PF: predicated region fallthrough
CT: control target
= control target key end

     0   :  { %s280_s0 = inlined_call_operand.vmem [shape: f32[16,128], index: 0, kind: input, shape index: {}]   ;;  %s281_s1 = inlined_call_operand.vmem [shape: f32[16,128], index: 1, kind: input, shape index: {}]   ;;  %s282_s2 = inlined_call_operand.hbm [shape: f32[1,1], index: 2, kind: output, shape index: {}]  }
   0x1   :  { %v89_v0 = vld [vmem:[%s280_s0] sm:$0xff]  ;;  %v90_v1 = vld [vmem:[%s280_s0 + $0x8] sm:$0xff] }
   0x2   :  { %v99_v2 = vand.u32 2147483647, %v89_v0  ;;  %v100_v3 = vand.u32 2147483647, %v90_v1 }
   0x3   :  { %7 = vsyncpa [#allocation4], 0  ;;  %v91_v14 = vld [vmem:[%s281_s1] sm:$0xff]  ;;  %v92_v15 = vld [vmem:[%s281_s1 + $0x8] sm:$0xff]  ;;  %v93_v17 = vmax.f32 %v89_v0, 0.0  ;;  %v94_v21 = vmax.f32 %v90_v1, 0.0 }
   0x4   :  { %v101_v4 = vsub.f32 0.0, %v99_v2  ;;  %v102_v5 = vsub.f32 0.0, %v100_v3  ;;  %v95_v18 = vmul.f32 %v91_v14, %v89_v0  ;;  %v96_v22 = vmul.f32 %v92_v15, %v90_v1  ;;  %s249_s16 = smov [#allocation3]  }
   0x6   :  { %v103_v6 = vmul.f32 1.442695, %v101_v4  ;;  %v105_v7 = vmul.f32 1.442695, %v102_v5  ;;  %v97_v26 = vsub.f32 %v93_v17, %v95_v18  ;;  %v98_v29 = vsub.f32 %v94_v21, %v96_v22 }
   0x8   :  { %231 = vpow2.f32 %v103_v6 }
   0x9   :  { %233 = vpow2.f32 %v105_v7 }
  0x15   :  { %v232_v8 = vpop.eup %231 }
  0x16   :  { %v234_v9 = vpop.eup %233  ;;  %v107_v10 = vadd.f32 1.0, %v232_v8  ;;  %v110_v12 = vmul.f32 -0.5, %v232_v8  ;;  %v113_v19 = vand.u32 2147483647, %v232_v8 }
  0x17   :  { %v116_v11 = vadd.f32 1.0, %v234_v9  ;;  %v119_v13 = vmul.f32 -0.5, %v234_v9  ;;  %v122_v23 = vand.u32 2147483647, %v234_v9 }
  0x18   :  { %235 = vlog2.f32 %v107_v10  ;;  %v111_v16 = vadd.f32 1.0, %v110_v12  ;;  %vm114_vm0 = vcmp.lt.f32.partialorder %v113_v19, 0.0004427343 }
  0x19   :  { %237 = vlog2.f32 %v116_v11  ;;  %v120_v20 = vadd.f32 1.0, %v119_v13  ;;  %vm123_vm1 = vcmp.lt.f32.partialorder %v122_v23, 0.0004427343 }
  0x1a   :  { %v112_v24 = vmul.f32 %v232_v8, %v111_v16 }
  0x1b   :  { %v121_v27 = vmul.f32 %v234_v9, %v120_v20 }
  0x25   :  { %v236_v25 = vpop.eup %235 }
  0x26   :  { %v238_v28 = vpop.eup %237  ;;  %v109_v30 = vmul.f32 0.6931472, %v236_v25 }
  0x27   :  { %v118_v31 = vmul.f32 0.6931472, %v238_v28 }
  0x28   :  { %v115_v32 = vsel %vm114_vm0, %v112_v24, %v109_v30 }
  0x29   :  { %v124_v33 = vsel %vm123_vm1, %v121_v27, %v118_v31  ;;  %v125_v34 = vadd.f32 %v115_v32, %v97_v26 }
  0x2a   :  { %v126_v35 = vadd.f32 %v124_v33, %v98_v29 }
  0x2c   :  { %v127_v36 = vadd.f32 %v126_v35, %v125_v34 }
  0x2e   :  { %192 = vadd.xlane.f32.xlu0 %v127_v36 }
  0xb7   :  { %v193_v37 = vpop.xlane.xlu0 %192 }
  0xb8   :  { %v194_v38 = vrot.slane %v193_v37, 4 }
  0xba   :  { %v195_v39 = vadd.f32 %v194_v38, %v193_v37 }
  0xbc   :  { %v196_v40 = vrot.slane %v195_v39, 2 }
  0xbe   :  { %v197_v41 = vadd.f32 %v196_v40, %v195_v39 }
  0xc0   :  { %v198_v42 = vrot.slane %v197_v41, 1 }
  0xc2   :  { %v199_v43 = vadd.f32 %v198_v42, %v197_v41 }
  0xc4   :  { %228 = vpush %v199_v43 }
  0xf5   :  { %s229_s1 = spop %228 }
  0xf6   :  { %202 = sst [smem:[#allocation3]] %s229_s1 }
  0xf7   :  { %210 = dma.smem_to_hbm %s249_s16, 16, %s282_s2, [#allocation4]  }
  0xf8   :  { %247 = dma.done.wait [#allocation4], 16  }
  0xf9   :  { %248 = vsyncadd [#allocation4], 4294967280 }
  0xfa   :  { %214 = sfence }
  0xfb   :  { %215 = vsyncpa [#allocation4], 1 }

</bundles_post_ra>
